<compile_context>
chip_gen: v7x
topology: tpu7x:2x2x1
jax: 0.10.0
libtpu: 0.0.40
codegen_flags: <defaults>
</compile_context>

<pallas_src>
import functools

import jax
import jax.numpy as jnp
from jax.experimental import pallas as pl
from jax.experimental.pallas import tpu as pltpu

# Above the v5e/v6e/v7x scoped defaults (16/32/32 MiB) but below v7x's 64 MiB
# physical VMEM, so large-but-sane tiles are accepted on every generation.
_VMEM_LIMIT = 48 * 1024 * 1024


def _tile(dim, pref, align):
    """Largest tile <= pref that divides dim and is a multiple of `align`.

    Falls back to the full dim (always a legal BlockSpec block) when the dim
    is small or has no aligned divisor — avoids hard divisibility asserts.
    """
    if dim <= pref:
        return dim
    t = (pref // align) * align
    while t >= align:
        if dim % t == 0:
            return t
        t -= align
    return dim


# ----------------------------------------------------------------------------
# Fused linear kernel: y = act(x @ w + b) [+ residual], tiled over (M, N, K)
# ----------------------------------------------------------------------------
def _linear_kernel(x_ref, w_ref, b_ref, *rest, activation, has_residual,
                   input_relu):
    if has_residual:
        r_ref, o_ref, acc_ref = rest
    else:
        o_ref, acc_ref = rest
    k = pl.program_id(2)

    @pl.when(k == 0)
    def _():
        acc_ref[...] = jnp.zeros_like(acc_ref)

    x = x_ref[...]
    if input_relu:                       # head: nn.Sequential(ReLU, Linear)
        x = jnp.maximum(x, 0.0)
    # bf16 MXU operands, f32 accumulation.
    acc_ref[...] += jnp.dot(x.astype(jnp.bfloat16), w_ref[...],
                            preferred_element_type=jnp.float32)

    @pl.when(k == pl.num_programs(2) - 1)
    def _():
        y = acc_ref[...] + b_ref[...]
        if activation == "gelu":
            # TODO(synk): ESM-1b uses exact erf GELU; tanh approximation used here.
            y = jax.nn.gelu(y)
        if has_residual:
            y = y + r_ref[...]           # fused residual add (saves an HBM pass)
        o_ref[...] = y.astype(o_ref.dtype)


def linear(x, w, b, activation=None, residual=None, input_relu=False,
           tm=256, tn=512, bk=512):
    """y = act(x @ w + b) (+ residual); x:(M,K) f32, w:(K,N) bf16, b:(N,) f32."""
    M, K = x.shape
    _, N = w.shape
    # Re-derive tiles per generation if needed: these defaults suit v6e; halve
    # tn/bk for v7x's 64 MiB VMEM; keep multiples of 128 (v5e MXU is 4x128^2).
    tm = _tile(M, tm, 8)
    tn = _tile(N, tn, 128)
    bk = _tile(K, bk, 128)

    in_specs = [
        pl.BlockSpec((tm, bk), lambda i, j, k: (i, k)),
        pl.BlockSpec((bk, tn), lambda i, j, k: (k, j)),
        pl.BlockSpec((1, tn), lambda i, j, k: (0, j)),
    ]
    args = [x, w, b.reshape(1, N)]
    if residual is not None:
        # Block index independent of k -> stays VMEM-resident across the K loop.
        in_specs.append(pl.BlockSpec((tm, tn), lambda i, j, k: (i, j)))
        args.append(residual)

    kernel = functools.partial(_linear_kernel, activation=activation,
                               has_residual=residual is not None,
                               input_relu=input_relu)
    return pl.pallas_call(
        kernel,
        out_shape=jax.ShapeDtypeStruct((M, N), jnp.float32),
        grid_spec=pltpu.PrefetchScalarGridSpec(
            num_scalar_prefetch=0,
            grid=(M // tm, N // tn, K // bk),       # K reduction innermost
            in_specs=in_specs,
            out_specs=pl.BlockSpec((tm, tn), lambda i, j, k: (i, j)),
            scratch_shapes=[pltpu.VMEM((tm, tn), jnp.float32)],
        ),
        compiler_params=pltpu.CompilerParams(
            dimension_semantics=("parallel", "parallel", "arbitrary"),
            vmem_limit_bytes=_VMEM_LIMIT),
    )(*args)


# ----------------------------------------------------------------------------
# LayerNorm (row-tiled, f32 math)
# ----------------------------------------------------------------------------
def _layernorm_kernel(x_ref, g_ref, b_ref, o_ref, *, eps):
    x = x_ref[...].astype(jnp.float32)
    mean = jnp.mean(x, axis=-1, keepdims=True)
    xc = x - mean
    var = jnp.mean(xc * xc, axis=-1, keepdims=True)
    inv = jax.lax.rsqrt(var + eps)
    o_ref[...] = (xc * inv * g_ref[...] + b_ref[...]).astype(o_ref.dtype)


def layernorm(x, g, b, eps=1e-5, bm=512):
    M, D = x.shape
    bm = _tile(M, bm, 8)                  # large row tiles: mem-bound kernel
    kernel = functools.partial(_layernorm_kernel, eps=eps)
    return pl.pallas_call(
        kernel,
        out_shape=jax.ShapeDtypeStruct((M, D), x.dtype),
        grid_spec=pltpu.PrefetchScalarGridSpec(
            num_scalar_prefetch=0,
            grid=(M // bm,),
            in_specs=[
                pl.BlockSpec((bm, D), lambda i: (i, 0)),
                pl.BlockSpec((1, D), lambda i: (0, 0)),
                pl.BlockSpec((1, D), lambda i: (0, 0)),
            ],
            out_specs=pl.BlockSpec((bm, D), lambda i: (i, 0)),
        ),
        compiler_params=pltpu.CompilerParams(
            dimension_semantics=("parallel",),
            vmem_limit_bytes=_VMEM_LIMIT),
    )(x, g.reshape(1, D), b.reshape(1, D))


# ----------------------------------------------------------------------------
# Multi-head attention on the fused QKV tensor.
# One batch element (all heads) per grid step; output already in (B, S, D)
# layout so no head split/merge transposes are needed outside the kernel.
# ----------------------------------------------------------------------------
def _attention_kernel(qkv_ref, o_ref, *, num_heads, scale):
    D = qkv_ref.shape[2] // 3
    Hd = D // num_heads
    outs = []
    for h in range(num_heads):            # static unroll over heads
        # softmax scale folded into q (S x Hd multiplies instead of S x S)
        q = (qkv_ref[0, :, pl.ds(h * Hd, Hd)] * scale).astype(jnp.bfloat16)
        k = qkv_ref[0, :, pl.ds(D + h * Hd, Hd)].astype(jnp.bfloat16)
        v = qkv_ref[0, :, pl.ds(2 * D + h * Hd, Hd)].astype(jnp.bfloat16)
        # q @ k^T without materializing a transpose.
        s = jax.lax.dot_general(q, k, (((1,), (1,)), ((), ())),
                                preferred_element_type=jnp.float32)
        m = jnp.max(s, axis=-1, keepdims=True)
        p = jnp.exp(s - m)
        p = p * pl.reciprocal(jnp.sum(p, axis=-1, keepdims=True), approx=True)
        outs.append(jnp.dot(p.astype(jnp.bfloat16), v,
                            preferred_element_type=jnp.float32))
    # Single lane-dense full-width store.
    o_ref[0] = jnp.concatenate(outs, axis=-1).astype(o_ref.dtype)
    # TODO(synk): for long sequences tile the KV axis flash-style so the SxS
    # scores per head stay within v7x's 64 MiB VMEM.


def attention(qkv, *, num_heads, scale):
    """qkv: (B, S, 3D) fused projections -> (B, S, D) attention output."""
    B, S, D3 = qkv.shape
    D = D3 // 3
    kernel = functools.partial(_attention_kernel, num_heads=num_heads,
                               scale=scale)
    return pl.pallas_call(
        kernel,
        out_shape=jax.ShapeDtypeStruct((B, S, D), jnp.float32),
        grid_spec=pltpu.PrefetchScalarGridSpec(
            num_scalar_prefetch=0,
            grid=(B,),
            in_specs=[pl.BlockSpec((1, S, D3), lambda b: (b, 0, 0))],
            out_specs=pl.BlockSpec((1, S, D), lambda b: (b, 0, 0)),
        ),
        compiler_params=pltpu.CompilerParams(
            dimension_semantics=("parallel",),
            vmem_limit_bytes=_VMEM_LIMIT),
    )(qkv)


# ----------------------------------------------------------------------------
# Parameter init (deterministic, synthetic) and forward pass glue
# ----------------------------------------------------------------------------
def init_params(key, *, vocab_size, max_seq, embed_dim, ffn_dim,
                num_layers, num_classes):
    def norm(k, shape, dtype=jnp.bfloat16, scale=0.02):
        return (scale * jax.random.normal(k, shape)).astype(dtype)

    keys = iter(jax.random.split(key, 4 + 4 * num_layers))
    D, F = embed_dim, ffn_dim
    c_pad = max(128, ((num_classes + 127) // 128) * 128)   # lane-dense head out
    head_w = jnp.zeros((D, c_pad), jnp.bfloat16)
    head_w = head_w.at[:, :num_classes].set(norm(next(keys), (D, num_classes)))
    p = {
        "tok_emb": norm(next(keys), (vocab_size, D), jnp.float32),
        "pos_emb": norm(next(keys), (max_seq, D), jnp.float32),
        "emb_ln_g": jnp.ones((D,), jnp.float32),
        "emb_ln_b": jnp.zeros((D,), jnp.float32),
        "final_ln_g": jnp.ones((D,), jnp.float32),
        "final_ln_b": jnp.zeros((D,), jnp.float32),
        "head_w": head_w,                                   # (D, c_pad) bf16
        "head_b": jnp.zeros((c_pad,), jnp.float32),
        "num_classes": num_classes,
        "layers": [],
    }
    for _ in range(num_layers):
        lp = {
            "ln1_g": jnp.ones((D,), jnp.float32), "ln1_b": jnp.zeros((D,), jnp.float32),
            "w_qkv": norm(next(keys), (D, 3 * D)),          # fused Q|K|V weight
            "b_qkv": jnp.zeros((3 * D,), jnp.float32),
            "wo": norm(next(keys), (D, D)), "bo": jnp.zeros((D,), jnp.float32),
            "ln2_g": jnp.ones((D,), jnp.float32), "ln2_b": jnp.zeros((D,), jnp.float32),
            "w1": norm(next(keys), (D, F)), "b1": jnp.zeros((F,), jnp.float32),
            "w2": norm(next(keys), (F, D)), "b2": jnp.zeros((D,), jnp.float32),
        }
        p["layers"].append(lp)
    return p


def fungenetyper_forward(tokens, params, *, num_heads):
    B, S = tokens.shape
    D = params["tok_emb"].shape[1]
    Hd = D // num_heads
    scale = 1.0 / (Hd ** 0.5)

    # embedding lookup (gather) stays in plain JAX glue
    x = params["tok_emb"][tokens] + params["pos_emb"][:S][None, :, :]
    x = x.reshape(B * S, D)
    # TODO(synk): ESM-1b token-dropout / padding-mask handling omitted (eval path, no padding)
    x = layernorm(x, params["emb_ln_g"], params["emb_ln_b"])

    for lp in params["layers"]:
        # --- self-attention block (pre-LN) ---
        residual = x
        h = layernorm(x, lp["ln1_g"], lp["ln1_b"])
        qkv = linear(h, lp["w_qkv"], lp["b_qkv"])           # (B*S, 3D), fused QKV
        a = attention(qkv.reshape(B, S, 3 * D),
                      num_heads=num_heads, scale=scale)     # (B, S, D)
        # wo projection with the residual add fused into the epilogue
        x = linear(a.reshape(B * S, D), lp["wo"], lp["bo"], residual=residual)

        # --- FFN block (pre-LN, GELU) ---
        residual = x
        h = layernorm(x, lp["ln2_g"], lp["ln2_b"])
        h = linear(h, lp["w1"], lp["b1"], activation="gelu")
        x = linear(h, lp["w2"], lp["b2"], residual=residual)

    # emb_layer_norm_after -> representations[last layer]
    x = layernorm(x, params["final_ln_g"], params["final_ln_b"])
    cls = x.reshape(B, S, D)[:, 0, :]                        # [:, 0, :].squeeze(1)
    # head: nn.Sequential(ReLU, Linear(D, C)) with C padded to 128 lanes
    logits = linear(cls, params["head_w"], params["head_b"], input_relu=True)
    return logits[:, :params["num_classes"]]


# ----------------------------------------------------------------------------
if __name__ == "__main__":
    # small synthetic shapes (real ESM-1b: 33 layers, D=1280, 20 heads)
    B, S = 4, 16
    D, HEADS, FFN, LAYERS = 128, 4, 512, 2
    VOCAB, CATEGORY = 33, 8

    key = jax.random.PRNGKey(0)
    pkey, tkey = jax.random.split(key)
    params = init_params(pkey, vocab_size=VOCAB, max_seq=S, embed_dim=D,
                         ffn_dim=FFN, num_layers=LAYERS, num_classes=CATEGORY)

    tokens = jax.random.randint(tkey, (B, S), 0, VOCAB, dtype=jnp.int32)
    tokens = tokens.at[:, 0].set(0)   # BOS/CLS token at position 0, like ESM

    logits = fungenetyper_forward(tokens, params, num_heads=HEADS)
    jax.block_until_ready(logits)
    assert logits.shape == (B, CATEGORY) and logits.dtype == jnp.float32
    print("KERNEL_OK")
</pallas_src>

<mosaic_0001>
module attributes {stable_mosaic.version = 11 : i64} {
  func.func @_layernorm_kernel(%arg0: i32, %arg1: memref<64x128xf32, #tpu.memory_space<vmem>>, %arg2: memref<1x128xf32, #tpu.memory_space<vmem>>, %arg3: memref<1x128xf32, #tpu.memory_space<vmem>>, %arg4: memref<64x128xf32, #tpu.memory_space<vmem>>) attributes {dimension_semantics = [#tpu.dimension_semantics<parallel>], iteration_bounds = array<i64: 1>, scalar_prefetch = 0 : i64, scratch_operands = 0 : i64, tpu.core_type = #tpu.core_type<tc>, window_params = [{transform_indices = @transform_0, window_bounds = array<i64: 64, 128>}, {pipeline_mode = #tpu.pipeline_mode<synchronous>, transform_indices = @transform_1, window_bounds = array<i64: 1, 128>}, {pipeline_mode = #tpu.pipeline_mode<synchronous>, transform_indices = @transform_2, window_bounds = array<i64: 1, 128>}, {transform_indices = @transform_3, window_bounds = array<i64: 64, 128>}]} {
    %c0 = arith.constant 0 : index
    %c0_0 = arith.constant 0 : index
    %0 = vector.load %arg1[%c0, %c0_0] : memref<64x128xf32, #tpu.memory_space<vmem>>, vector<64x128xf32>
    %cst = arith.constant dense<0.000000e+00> : vector<64xf32>
    %1 = vector.multi_reduction <add>, %0, %cst [1] : vector<64x128xf32> to vector<64xf32>
    %2 = vector.shape_cast %1 : vector<64xf32> to vector<64x1xf32>
    %cst_1 = arith.constant 1.280000e+02 : f32
    %3 = vector.broadcast %cst_1 : f32 to vector<64x1xf32>
    %4 = arith.divf %2, %3 : vector<64x1xf32>
    %5 = vector.broadcast %4 : vector<64x1xf32> to vector<64x128xf32>
    %6 = arith.subf %0, %5 : vector<64x128xf32>
    %7 = arith.mulf %6, %6 : vector<64x128xf32>
    %cst_2 = arith.constant dense<0.000000e+00> : vector<64xf32>
    %8 = vector.multi_reduction <add>, %7, %cst_2 [1] : vector<64x128xf32> to vector<64xf32>
    %9 = vector.shape_cast %8 : vector<64xf32> to vector<64x1xf32>
    %cst_3 = arith.constant 1.280000e+02 : f32
    %10 = vector.broadcast %cst_3 : f32 to vector<64x1xf32>
    %11 = arith.divf %9, %10 : vector<64x1xf32>
    %cst_4 = arith.constant 9.99999974E-6 : f32
    %12 = vector.broadcast %cst_4 : f32 to vector<64x1xf32>
    %13 = arith.addf %11, %12 : vector<64x1xf32>
    %14 = math.rsqrt %13 : vector<64x1xf32>
    %15 = vector.broadcast %14 : vector<64x1xf32> to vector<64x128xf32>
    %16 = arith.mulf %6, %15 : vector<64x128xf32>
    %c0_5 = arith.constant 0 : index
    %c0_6 = arith.constant 0 : index
    %17 = vector.load %arg2[%c0_5, %c0_6] : memref<1x128xf32, #tpu.memory_space<vmem>>, vector<1x128xf32>
    %18 = vector.broadcast %17 : vector<1x128xf32> to vector<64x128xf32>
    %19 = arith.mulf %16, %18 : vector<64x128xf32>
    %c0_7 = arith.constant 0 : index
    %c0_8 = arith.constant 0 : index
    %20 = vector.load %arg3[%c0_7, %c0_8] : memref<1x128xf32, #tpu.memory_space<vmem>>, vector<1x128xf32>
    %21 = vector.broadcast %20 : vector<1x128xf32> to vector<64x128xf32>
    %22 = arith.addf %19, %21 : vector<64x128xf32>
    %c0_9 = arith.constant 0 : index
    %c0_10 = arith.constant 0 : index
    %23 = vector.load %arg4[%c0_9, %c0_10] : memref<64x128xf32, #tpu.memory_space<vmem>>, vector<64x128xf32>
    tpu.vector_store %arg4[%c0_9, %c0_10], %22 {strides = array<i32>} : memref<64x128xf32, #tpu.memory_space<vmem>>, vector<64x128xf32>,
    return
  }
  func.func @transform_0(%arg0: i32) -> (i32, i32) {
    %c0_i32 = arith.constant 0 : i32
    %c0_i32_0 = arith.constant 0 : i32
    return %arg0, %c0_i32 : i32, i32
  }
  func.func @transform_1(%arg0: i32) -> (i32, i32) {
    %c0_i32 = arith.constant 0 : i32
    %c0_i32_0 = arith.constant 0 : i32
    %c0_i32_1 = arith.constant 0 : i32
    return %c0_i32, %c0_i32_0 : i32, i32
  }
  func.func @transform_2(%arg0: i32) -> (i32, i32) {
    %c0_i32 = arith.constant 0 : i32
    %c0_i32_0 = arith.constant 0 : i32
    %c0_i32_1 = arith.constant 0 : i32
    return %c0_i32, %c0_i32_0 : i32, i32
  }
  func.func @transform_3(%arg0: i32) -> (i32, i32) {
    %c0_i32 = arith.constant 0 : i32
    %c0_i32_0 = arith.constant 0 : i32
    return %arg0, %c0_i32 : i32, i32
  }
}

</mosaic_0001>

<bundles_post_ra>
// kernel: tpu_custom_call.1
= control target key start
LH: loop header
LB: loop body
LE: loop exit
PB: predicated region body
PF: predicated region fallthrough
CT: control target
= control target key end

     0   :  { %8 = vsyncpa [#allocation3], 0  ;;  %s351_s0 = inlined_call_operand.hbm [shape: f32[64,128], index: 0, kind: input, shape index: {}]   ;;  %s352_s1 = inlined_call_operand.vmem [shape: f32[1,128], index: 1, kind: input, shape index: {}]   ;;  %s353_s2 = inlined_call_operand.vmem [shape: f32[1,128], index: 2, kind: input, shape index: {}]   ;;  %s354_s3 = inlined_call_operand.hbm [shape: f32[64,128], index: 3, kind: output, shape index: {}]  }
   0x1   :  { %9 = vsyncpa [#allocation4], 0  ;;  %s251_s12 = smov [#allocation2]   ;;  %s203_s16 = scalar_lea.hbm %s351_s0, 1024 }
   0x2   :  { %s15_s13 = sshll.u32 %s251_s12, 4  ;;  %p204_p0 = scmp.ne.s32.totalorder %s351_s0, %s203_s16  ;;  %s16_s13 = int_to_ptr.vmem [resolvable:$true] %s15_s13 }
   0x3   :  { %p207_p1 = scmp.lt.u32.totalorder %s203_s16, %s351_s0 }
   0x5   :  { %p209_p2 = pnand %p207_p1, %p204_p0 }
   0x7   :  { %212 = shalt.err (!%p209_p2)
}
   0x8   :  { %s213_s21 = scalar_lea.vmem %s16_s13, 1024  ;;  %p218_p4 = scmp.lt.s32.totalorder %s16_s13, %s16_s13 }
   0x9   :  { %p214_p3 = scmp.ne.s32.totalorder %s16_s13, %s213_s21  ;;  %p219_p5 = scmp.lt.s32.totalorder %s213_s21, %s213_s21 }
   0xb   :  { %p220_p6 = por %p219_p5, %p218_p4 }
   0xd   :  { %p221_p7 = pnand %p220_p6, %p214_p3 }
   0xf   :  { %224 = shalt.err (!%p221_p7)
}
  0x10   :  { %s252_s22 = smov 128   ;;  %s253_s23 = smov 8  }
  0x11   :  { %21 = dma.hbm_to_vmem [thread:$0]  %s351_s0, 1024, %s16_s13, [#allocation3], %s252_s22, %s252_s22, %s253_s23  }
  0x12   :  { %247 = dma.done.wait [#allocation3], 1024  }
  0x13   :  { %248 = vsyncadd [#allocation3], 4294966272  ;;  %v29_v0 = vld [vmem:[#allocation2] sm:$0xff]  ;;  %v31_v1 = vld [vmem:[#allocation2 + $0x10] sm:$0xff] }
  0x14   :  { %37 = vadd.xlane.f32.xlu0 %v29_v0  ;;  %41 = vadd.xlane.f32.xlu1 %v31_v1  ;;  %v30_v2 = vld [vmem:[#allocation2 + $0x8] sm:$0xff]  ;;  %v32_v3 = vld [vmem:[#allocation2 + $0x18] sm:$0xff]  ;;  %v33_v4 = vld [vmem:[#allocation2 + $0x20] sm:$0xff] }
  0x15   :  { %v34_v5 = vld [vmem:[#allocation2 + $0x28] sm:$0xff]  ;;  %v35_v6 = vld [vmem:[#allocation2 + $0x30] sm:$0xff]  ;;  %v36_v7 = vld [vmem:[#allocation2 + $0x38] sm:$0xff] }
  0x16   :  { %v181_v60 = vld [vmem:[%s352_s1] ss:$0 sm:$0xff]  ;;  %s254_s1 = smov [#allocation5]  }
  0x18   :  { %39 = vadd.xlane.f32.xlu0 %v30_v2  ;;  %43 = vadd.xlane.f32.xlu1 %v32_v3 }
  0x1c   :  { %45 = vadd.xlane.f32.xlu0 %v33_v4  ;;  %47 = vadd.xlane.f32.xlu1 %v34_v5 }
  0x20   :  { %49 = vadd.xlane.f32.xlu0 %v35_v6  ;;  %51 = vadd.xlane.f32.xlu1 %v36_v7 }
  0xa1   :  { %v38_v8 = vpop.xlane.xlu0 %37  ;;  %v42_v9 = vpop.xlane.xlu1 %41 }
  0xa2   :  { %v54_v10 = vmul.f32 0.0078125, %v38_v8  ;;  %v56_v11 = vmul.f32 0.0078125, %v42_v9 }
  0xa4   :  { %v290_v12 = vsub.f32 %v29_v0, %v54_v10  ;;  %v292_v13 = vsub.f32 %v31_v1, %v56_v11  ;;  %v182_v1 = vld [vmem:[%s353_s2] ss:$0 sm:$0xff]  ;;  %s169_s2 = sshll.u32 %s254_s1, 4  ;;  %s170_s2 = int_to_ptr.vmem [resolvable:$true] %s169_s2 }
  0xa5   :  { %v40_v14 = vpop.xlane.xlu0 %39  ;;  %v44_v15 = vpop.xlane.xlu1 %43  ;;  %s225_s29 = scalar_lea.vmem %s170_s2, 1024  ;;  %p230_p9 = scmp.lt.s32.totalorder %s170_s2, %s170_s2 }
  0xa6   :  { %v55_v16 = vmul.f32 0.0078125, %v40_v14  ;;  %v70_v17 = vmul.f32 %v290_v12, %v290_v12  ;;  %v57_v18 = vmul.f32 0.0078125, %v44_v15  ;;  %v72_v21 = vmul.f32 %v292_v13, %v292_v13  ;;  %p226_p8 = scmp.ne.s32.totalorder %s170_s2, %s225_s29  ;;  %p231_p10 = scmp.lt.s32.totalorder %s225_s29, %s225_s29 }
  0xa8   :  { %v296_v19 = vsub.f32 %v30_v2, %v55_v16  ;;  %78 = vadd.xlane.f32.xlu0 %v70_v17  ;;  %v298_v20 = vsub.f32 %v32_v3, %v57_v18  ;;  %p232_p11 = por %p231_p10, %p230_p9 }
  0xa9   :  { %v46_v22 = vpop.xlane.xlu0 %45  ;;  %v48_v23 = vpop.xlane.xlu1 %47 }
  0xaa   :  { %v58_v24 = vmul.f32 0.0078125, %v46_v22  ;;  %v71_v25 = vmul.f32 %v296_v19, %v296_v19  ;;  %v59_v26 = vmul.f32 0.0078125, %v48_v23  ;;  %v73_v29 = vmul.f32 %v298_v20, %v298_v20  ;;  %p233_p12 = pnand %p232_p11, %p226_p8 }
  0xac   :  { %v304_v27 = vsub.f32 %v33_v4, %v58_v24  ;;  %82 = vadd.xlane.f32.xlu0 %v72_v21  ;;  %80 = vadd.xlane.f32.xlu1 %v71_v25  ;;  %v306_v28 = vsub.f32 %v34_v5, %v59_v26 }
  0xad   :  { %v50_v30 = vpop.xlane.xlu0 %49  ;;  %v52_v31 = vpop.xlane.xlu1 %51 }
  0xae   :  { %v60_v32 = vmul.f32 0.0078125, %v50_v30  ;;  %v74_v33 = vmul.f32 %v304_v27, %v304_v27  ;;  %v61_v34 = vmul.f32 0.0078125, %v52_v31  ;;  %v75_v37 = vmul.f32 %v306_v28, %v306_v28 }
  0xb0   :  { %v312_v35 = vsub.f32 %v35_v6, %v60_v32  ;;  %84 = vadd.xlane.f32.xlu1 %v73_v29  ;;  %86 = vadd.xlane.f32.xlu0 %v74_v33  ;;  %v314_v36 = vsub.f32 %v36_v7, %v61_v34 }
  0xb2   :  { %v76_v38 = vmul.f32 %v312_v35, %v312_v35  ;;  %v77_v39 = vmul.f32 %v314_v36, %v314_v36 }
  0xb4   :  { %88 = vadd.xlane.f32.xlu1 %v75_v37  ;;  %90 = vadd.xlane.f32.xlu0 %v76_v38 }
  0xb8   :  { %92 = vadd.xlane.f32.xlu1 %v77_v39 }
 0x135   :  { %v79_v40 = vpop.xlane.xlu0 %78 }
 0x136   :  { %v94_v41 = vmul.f32 0.0078125, %v79_v40 }
 0x138   :  { %v102_v42 = vadd.f32 1e-05, %v94_v41 }
 0x139   :  { %v81_v43 = vpop.xlane.xlu1 %80  ;;  %v83_v44 = vpop.xlane.xlu0 %82 }
 0x13a   :  { %187 = vrsqrt.f32 %v102_v42  ;;  %v95_v45 = vmul.f32 0.0078125, %v81_v43  ;;  %v96_v46 = vmul.f32 0.0078125, %v83_v44 }
 0x13c   :  { %v103_v47 = vadd.f32 1e-05, %v95_v45  ;;  %v104_v48 = vadd.f32 1e-05, %v96_v46 }
 0x13d   :  { %v85_v49 = vpop.xlane.xlu1 %84  ;;  %v87_v50 = vpop.xlane.xlu0 %86 }
 0x13e   :  { %189 = vrsqrt.f32 %v103_v47  ;;  %v97_v51 = vmul.f32 0.0078125, %v85_v49  ;;  %v98_v52 = vmul.f32 0.0078125, %v87_v50 }
 0x13f   :  { %191 = vrsqrt.f32 %v104_v48 }
 0x140   :  { %v105_v53 = vadd.f32 1e-05, %v97_v51  ;;  %v106_v54 = vadd.f32 1e-05, %v98_v52 }
 0x141   :  { %v89_v55 = vpop.xlane.xlu1 %88  ;;  %v91_v56 = vpop.xlane.xlu0 %90 }
 0x142   :  { %193 = vrsqrt.f32 %v105_v53  ;;  %v99_v57 = vmul.f32 0.0078125, %v89_v55  ;;  %v100_v58 = vmul.f32 0.0078125, %v91_v56 }
 0x143   :  { %195 = vrsqrt.f32 %v106_v54 }
 0x144   :  { %v188_v59 = vpop.eup %187  ;;  %v107_v61 = vadd.f32 1e-05, %v99_v57  ;;  %v108_v62 = vadd.f32 1e-05, %v100_v58 }
 0x145   :  { %v118_v63 = vmul.f32 %v188_v59, %v290_v12  ;;  %v93_v0 = vpop.xlane.xlu1 %92 }
 0x146   :  { %197 = vrsqrt.f32 %v107_v61  ;;  %v101_v2 = vmul.f32 0.0078125, %v93_v0 }
 0x147   :  { %v133_v3 = vmul.f32 %v181_v60, %v118_v63  ;;  %199 = vrsqrt.f32 %v108_v62 }
 0x148   :  { %v190_v4 = vpop.eup %189  ;;  %v109_v5 = vadd.f32 1e-05, %v101_v2 }
 0x149   :  { %v192_v6 = vpop.eup %191  ;;  %v148_v7 = vadd.f32 %v182_v1, %v133_v3  ;;  %v119_v8 = vmul.f32 %v190_v4, %v296_v19 }
 0x14a   :  { %v120_v9 = vmul.f32 %v192_v6, %v292_v13  ;;  %201 = vrsqrt.f32 %v109_v5 }
 0x14b   :  { %156 = vst [vmem:[#allocation5] sm:$0xff] %v148_v7  ;;  %v134_v10 = vmul.f32 %v181_v60, %v119_v8 }
 0x14c   :  { %v194_v11 = vpop.eup %193  ;;  %v135_v12 = vmul.f32 %v181_v60, %v120_v9 }
 0x14d   :  { %v196_v14 = vpop.eup %195  ;;  %v149_v15 = vadd.f32 %v182_v1, %v134_v10  ;;  %v121_v16 = vmul.f32 %v194_v11, %v298_v20 }
 0x14e   :  { %v150_v17 = vadd.f32 %v182_v1, %v135_v12  ;;  %v122_v18 = vmul.f32 %v196_v14, %v304_v27 }
 0x14f   :  { %157 = vst [vmem:[#allocation5 + $0x8] sm:$0xff] %v149_v15  ;;  %v136_v21 = vmul.f32 %v181_v60, %v121_v16 }
 0x150   :  { %v198_v22 = vpop.eup %197  ;;  %158 = vst [vmem:[#allocation5 + $0x10] sm:$0xff] %v150_v17  ;;  %v137_v23 = vmul.f32 %v181_v60, %v122_v18 }
 0x151   :  { %v200_v19 = vpop.eup %199  ;;  %v151_v24 = vadd.f32 %v182_v1, %v136_v21  ;;  %v123_v13 = vmul.f32 %v198_v22, %v306_v28 }
 0x152   :  { %v152_v25 = vadd.f32 %v182_v1, %v137_v23  ;;  %v124_v26 = vmul.f32 %v200_v19, %v312_v35 }
 0x153   :  { %159 = vst [vmem:[#allocation5 + $0x18] sm:$0xff] %v151_v24  ;;  %v138_v29 = vmul.f32 %v181_v60, %v123_v13 }
 0x154   :  { %v202_v30 = vpop.eup %201  ;;  %160 = vst [vmem:[#allocation5 + $0x20] sm:$0xff] %v152_v25  ;;  %v139_v20 = vmul.f32 %v181_v60, %v124_v26 }
 0x155   :  { %v153_v31 = vadd.f32 %v182_v1, %v138_v29  ;;  %v125_v27 = vmul.f32 %v202_v30, %v314_v36 }
 0x156   :  { %v154_v32 = vadd.f32 %v182_v1, %v139_v20 }
 0x157   :  { %161 = vst [vmem:[#allocation5 + $0x28] sm:$0xff] %v153_v31  ;;  %v140_v33 = vmul.f32 %v181_v60, %v125_v27 }
 0x158   :  { %162 = vst [vmem:[#allocation5 + $0x30] sm:$0xff] %v154_v32 }
 0x159   :  { %v155_v34 = vadd.f32 %v182_v1, %v140_v33 }
 0x15b   :  { %163 = vst [vmem:[#allocation5 + $0x38] sm:$0xff] %v155_v34 }
 0x15c   :  { %236 = shalt.err (!%p233_p12)
}
 0x15d   :  { %s237_s5 = scalar_lea.hbm %s354_s3, 1024 }
 0x15e   :  { %p238_p13 = scmp.ne.s32.totalorder %s354_s3, %s237_s5  ;;  %p241_p0 = scmp.lt.u32.totalorder %s237_s5, %s354_s3 }
 0x160   :  { %p243_p1 = pnand %p241_p0, %p238_p13 }
 0x162   :  { %246 = shalt.err (!%p243_p1)
}
 0x163   :  { %175 = dma.vmem_to_hbm [thread:$0]  %s170_s2, 1024, %s354_s3, [#allocation4], %s252_s22, %s252_s22, %s253_s23  }
 0x164   :  { %249 = dma.done.wait [#allocation4], 1024  }
 0x165   :  { %250 = vsyncadd [#allocation4], 4294966272 }
 0x166   :  { %179 = vsyncpa [#allocation3], 1 }
 0x167   :  { %180 = vsyncpa [#allocation4], 1 }

</bundles_post_ra>
